<compile_context>
chip_gen: v7x
topology: tpu7x:2x2x1
jax: 0.10.0
libtpu: 0.0.40
codegen_flags: <defaults>
</compile_context>

<pallas_src>
import functools

import jax
import jax.numpy as jnp
import numpy as np
from jax.experimental import pallas as pl
from jax.experimental.pallas import tpu as pltpu


# ----------------------------- kernels --------------------------------------


def _shift2d_flat_kernel(x_ref, m_ref, o_ref, *, roll_shift: int):
    """Tile (TC, H*W): one lane-axis roll + broadcasting select, single write."""
    x = x_ref[...]
    shifted = pltpu.roll(x, shift=roll_shift, axis=1) if roll_shift else x
    # m_ref is (1, H*W) int32 (1 = keep); broadcasts over the channel block.
    o_ref[...] = jnp.where(m_ref[...] != 0, shifted, jnp.zeros_like(shifted))


def _shift2d_plane_kernel(x_ref, m_ref, o_ref, *, vert_roll: int, horz_roll: int):
    """Fallback tile (TC, H, W): two rolls + broadcasting select."""
    shifted = x_ref[...]
    if vert_roll:
        shifted = pltpu.roll(shifted, shift=vert_roll, axis=1)
    if horz_roll:
        shifted = pltpu.roll(shifted, shift=horz_roll, axis=2)
    o_ref[...] = jnp.where(m_ref[...] != 0, shifted, jnp.zeros_like(shifted))


# --------------------------- tiling heuristics -------------------------------


def _budgets():
    """(tile_target_bytes, vmem_limit_bytes, prefer_even_grid) per TPU generation."""
    try:
        vmem_phys = pltpu.get_tpu_info().vmem_capacity_bytes
    except Exception:
        vmem_phys = 64 << 20  # unknown -> assume the smallest (v7x-like)
    if vmem_phys >= (100 << 20):          # v5e / v6e: 128 MiB physical VMEM, 1 TC
        return 16 << 20, 96 << 20, False
    # v7x: 64 MiB physical per TC, 2 TCs -> smaller tiles, prefer even grid.
    return 6 << 20, 40 << 20, True


def _legal_channel_blocks(n_planes: int, flat: bool):
    """Divisors of n_planes that are legal block sizes for the channel axis."""
    divs = [d for d in range(1, n_planes + 1) if n_planes % d == 0]
    if flat:
        # (8,128) rule: second-to-last block dim must be %8==0 or the full dim.
        return [d for d in divs if d == n_planes or d % 8 == 0]
    # Plane path: last two block dims are the full (H, W), channel dim is free.
    return divs


def _pick_tc(cands, n_planes, plane_bytes, target_bytes, prefer_even_grid):
    fit = [tc for tc in cands if tc * plane_bytes <= target_bytes]
    if not fit:
        return None
    if prefer_even_grid:
        even = [tc for tc in fit if (n_planes // tc) % 2 == 0]
        if even:
            return max(even)
    return max(fit)


# ------------------------------- wrapper -------------------------------------


def shift2d(x: jax.Array, shift, *, donate: bool = False) -> jax.Array:
    """Pallas implementation of Shift2d.forward for NCHW input."""
    vert, horz = int(shift[0]), int(shift[1])
    B, C, H, W = x.shape

    if vert == 0 and horz == 0:
        return x  # identity shift

    N, HW = B * C, H * W
    plane_bytes = HW * x.dtype.itemsize
    target_bytes, vmem_limit, prefer_even = _budgets()

    # Host-side validity mask, computed once (not per channel plane).
    rows = np.arange(H)[:, None]
    cols = np.arange(W)[None, :]
    valid = np.ones((H, W), dtype=bool)
    if vert > 0:
        valid &= rows >= vert
    elif vert < 0:
        valid &= rows < H + vert
    if horz > 0:
        valid &= cols >= horz
    elif horz < 0:
        valid &= cols < W + horz
    mask_np = valid.astype(np.int32)

    flat_tc = _pick_tc(_legal_channel_blocks(N, flat=True), N, plane_bytes,
                       target_bytes, prefer_even)

    if flat_tc is not None:
        # Lane-dense path: (N, H*W), single roll along the flat lane axis.
        roll_shift = (vert * W + horz) % HW
        kernel = functools.partial(_shift2d_flat_kernel, roll_shift=roll_shift)
        grid = (N // flat_tc,)
        x_in = x.reshape(N, HW)
        mask = jnp.asarray(mask_np.reshape(1, HW))
        in_specs = [pl.BlockSpec((flat_tc, HW), lambda i: (i, 0)),
                    pl.BlockSpec((1, HW), lambda i: (0, 0))]
        out_spec = pl.BlockSpec((flat_tc, HW), lambda i: (i, 0))
        out_shape = jax.ShapeDtypeStruct((N, HW), x.dtype)
    else:
        # Fallback for planes too large for the flat-path budget.
        # TODO(synk): sub-plane halo tiling along H for single planes > VMEM.
        tc = _pick_tc(_legal_channel_blocks(N, flat=False), N, plane_bytes,
                      target_bytes, prefer_even) or 1
        vmem_limit = max(vmem_limit, 4 * tc * plane_bytes + (8 << 20))
        kernel = functools.partial(_shift2d_plane_kernel,
                                   vert_roll=vert % H, horz_roll=horz % W)
        grid = (N // tc,)
        x_in = x.reshape(N, H, W)
        mask = jnp.asarray(mask_np.reshape(1, H, W))
        in_specs = [pl.BlockSpec((tc, H, W), lambda i: (i, 0, 0)),
                    pl.BlockSpec((1, H, W), lambda i: (0, 0, 0))]
        out_spec = pl.BlockSpec((tc, H, W), lambda i: (i, 0, 0))
        out_shape = jax.ShapeDtypeStruct((N, H, W), x.dtype)

    out = pl.pallas_call(
        kernel,
        out_shape=out_shape,
        grid=grid,
        in_specs=in_specs,
        out_specs=out_spec,
        input_output_aliases=({0: 0} if donate else {}),
        compiler_params=pltpu.CompilerParams(
            dimension_semantics=("parallel",),
            vmem_limit_bytes=vmem_limit,
        ),
        cost_estimate=pl.CostEstimate(
            flops=0,
            transcendentals=0,
            bytes_accessed=2 * x.size * x.dtype.itemsize + mask_np.size * 4,
        ),
    )(x_in, mask)

    return out.reshape(B, C, H, W)


# ------------------------------ reference ------------------------------------


def shift2d_reference(x: jax.Array, shift) -> jax.Array:
    """Pure-JAX reference reproducing the torch pad+crop sequence."""
    vert, horz = int(shift[0]), int(shift[1])
    y_a, y_b = abs(vert), 0
    x_a, x_b = abs(horz), 0
    if vert < 0:
        y_a, y_b = y_b, y_a
    if horz < 0:
        x_a, x_b = x_b, x_a
    # ZeroPad2d((x_a, x_b, y_a, y_b)): left=x_a, right=x_b, top=y_a, bottom=y_b
    xp = jnp.pad(x, ((0, 0), (0, 0), (y_a, y_b), (x_a, x_b)))
    # Crop2d((x_b, x_a, y_b, y_a)): left=x_b, right=x_a, top=y_b, bottom=y_a
    Hp, Wp = xp.shape[-2], xp.shape[-1]
    return xp[:, :, y_b:Hp - y_a, x_b:Wp - x_a]


if __name__ == "__main__":
    key = jax.random.PRNGKey(0)
    B, C, H, W = 2, 4, 16, 16
    x = jax.random.normal(key, (B, C, H, W), dtype=jnp.float32)

    for shift in [(1, -2), (-3, 0), (0, 5), (2, 3), (0, 0), (17, -2), (-1, 16)]:
        out = jax.block_until_ready(shift2d(x, shift))
        ref = shift2d_reference(x, shift)
        np.testing.assert_allclose(np.asarray(out), np.asarray(ref), atol=0, rtol=0)

    print("KERNEL_OK")
</pallas_src>

<mosaic_0001>
module attributes {stable_mosaic.version = 11 : i64} {
  func.func @_shift2d_flat_kernel(%arg0: i32, %arg1: memref<8x256xf32, #tpu.memory_space<vmem>>, %arg2: memref<1x256xi32, #tpu.memory_space<vmem>>, %arg3: memref<8x256xf32, #tpu.memory_space<vmem>>) attributes {dimension_semantics = [#tpu.dimension_semantics<parallel>], iteration_bounds = array<i64: 1>, scalar_prefetch = 0 : i64, scratch_operands = 0 : i64, tpu.core_type = #tpu.core_type<tc>, window_params = [{transform_indices = @transform_0, window_bounds = array<i64: 8, 256>}, {pipeline_mode = #tpu.pipeline_mode<synchronous>, transform_indices = @transform_1, window_bounds = array<i64: 1, 256>}, {transform_indices = @transform_2, window_bounds = array<i64: 8, 256>}]} {
    %c0 = arith.constant 0 : index
    %c0_0 = arith.constant 0 : index
    %0 = vector.load %arg1[%c0, %c0_0] : memref<8x256xf32, #tpu.memory_space<vmem>>, vector<8x256xf32>
    %c14_i32 = arith.constant 14 : i32
    %1 = tpu.dynamic_rotate %0 by %c14_i32 dim 1 : vector<8x256xf32>, i32 -> vector<8x256xf32>
    %c0_1 = arith.constant 0 : index
    %c0_2 = arith.constant 0 : index
    %2 = vector.load %arg2[%c0_1, %c0_2] : memref<1x256xi32, #tpu.memory_space<vmem>>, vector<1x256xi32>
    %c0_i32 = arith.constant 0 : i32
    %3 = vector.broadcast %c0_i32 : i32 to vector<1x256xi32>
    %4 = arith.cmpi ne, %2, %3 : vector<1x256xi32>
    %cst = arith.constant 0.000000e+00 : f32
    %5 = vector.broadcast %cst : f32 to vector<8x256xf32>
    %6 = vector.shape_cast %4 : vector<1x256xi1> to vector<1x256xi1>
    %7 = vector.broadcast %6 : vector<1x256xi1> to vector<8x256xi1>
    %8 = arith.select %7, %1, %5 : vector<8x256xi1>, vector<8x256xf32>
    %c0_3 = arith.constant 0 : index
    %c0_4 = arith.constant 0 : index
    %9 = vector.load %arg3[%c0_3, %c0_4] : memref<8x256xf32, #tpu.memory_space<vmem>>, vector<8x256xf32>
    tpu.vector_store %arg3[%c0_3, %c0_4], %8 {strides = array<i32>} : memref<8x256xf32, #tpu.memory_space<vmem>>, vector<8x256xf32>,
    return
  }
  func.func @transform_0(%arg0: i32) -> (i32, i32) {
    %c0_i32 = arith.constant 0 : i32
    %c0_i32_0 = arith.constant 0 : i32
    return %arg0, %c0_i32 : i32, i32
  }
  func.func @transform_1(%arg0: i32) -> (i32, i32) {
    %c0_i32 = arith.constant 0 : i32
    %c0_i32_0 = arith.constant 0 : i32
    %c0_i32_1 = arith.constant 0 : i32
    return %c0_i32, %c0_i32_0 : i32, i32
  }
  func.func @transform_2(%arg0: i32) -> (i32, i32) {
    %c0_i32 = arith.constant 0 : i32
    %c0_i32_0 = arith.constant 0 : i32
    return %arg0, %c0_i32 : i32, i32
  }
}

</mosaic_0001>

<bundles_post_ra>
// kernel: tpu_custom_call.1
= control target key start
LH: loop header
LB: loop body
LE: loop exit
PB: predicated region body
PF: predicated region fallthrough
CT: control target
= control target key end

     0   :  { %7 = vsyncpa [#allocation3], 0  ;;  %s165_s0 = inlined_call_operand.hbm [shape: f32[8,256], index: 0, kind: input, shape index: {}]   ;;  %s166_s1 = inlined_call_operand.vmem [shape: s32[1,256], index: 1, kind: input, shape index: {}]   ;;  %s167_s2 = inlined_call_operand.hbm [shape: f32[8,256], index: 2, kind: output, shape index: {}]  }
   0x1   :  { %8 = vsyncpa [#allocation4], 0  ;;  %s119_s9 = smov [#allocation2]   ;;  %s71_s13 = scalar_lea.hbm %s165_s0, 256 }
   0x2   :  { %s15_s10 = sshll.u32 %s119_s9, 4  ;;  %p72_p0 = scmp.ne.s32.totalorder %s165_s0, %s71_s13  ;;  %s16_s10 = int_to_ptr.vmem [resolvable:$true] %s15_s10 }
   0x3   :  { %p75_p1 = scmp.lt.u32.totalorder %s71_s13, %s165_s0 }
   0x5   :  { %p77_p2 = pnand %p75_p1, %p72_p0 }
   0x7   :  { %80 = shalt.err (!%p77_p2)
}
   0x8   :  { %s81_s18 = scalar_lea.vmem %s16_s10, 256  ;;  %p86_p4 = scmp.lt.s32.totalorder %s16_s10, %s16_s10 }
   0x9   :  { %p82_p3 = scmp.ne.s32.totalorder %s16_s10, %s81_s18  ;;  %p87_p5 = scmp.lt.s32.totalorder %s81_s18, %s81_s18 }
   0xb   :  { %p88_p6 = por %p87_p5, %p86_p4 }
   0xd   :  { %p89_p7 = pnand %p88_p6, %p82_p3 }
   0xf   :  { %92 = shalt.err (!%p89_p7)
}
  0x10   :  { %18 = dma.hbm_to_vmem [thread:$0]  %s165_s0, 256, %s16_s10, [#allocation3]  }
  0x11   :  { %115 = dma.done.wait [#allocation3], 256  }
  0x12   :  { %116 = vsyncadd [#allocation3], 4294967040  ;;  %v24_v0 = vld [vmem:[#allocation2] sm:$0xff]  ;;  %s120_s21 = smov 14   ;;  %v25_v1 = vld [vmem:[#allocation2 + $0x8] sm:$0xff]  ;;  %v30_v2 = vlaneseq  ;;  %v121_v7 = vmov 0  }
  0x13   :  { %26 = vrot.lane.b32.xlu0 %v24_v0, %s120_s21  ;;  %v35_v3 = vld [vmem:[%s166_s1] sm:$0x3]  ;;  %s122_s0 = smov [#allocation5]  }
  0x14   :  { %v39_v4 = vshrl.u32 %v30_v2, 7  ;;  %vm36_vm0 = vcmp.ne.s32.totalorder %v35_v3, 0  ;;  %v31_v9 = vand.u32 127, %v30_v2  ;;  %s58_s24 = sshll.u32 %s122_s0, 4  ;;  %s59_s24 = int_to_ptr.vmem [resolvable:$true] %s58_s24 }
  0x15   :  { %v37_v8 = vsel %vm36_vm0, 1, %v121_v7  ;;  %s93_s1 = scalar_lea.vmem %s59_s24, 256  ;;  %p98_p9 = scmp.lt.s32.totalorder %s59_s24, %s59_s24 }
  0x16   :  { %v40_v5 = vsub.s32 0, %v39_v4  ;;  %v44_v6 = vsub.s32 1, %v39_v4  ;;  %vm32_vm1 = vcmp.lt.s32.totalorder %v31_v9, 14  ;;  %p94_p8 = scmp.ne.s32.totalorder %s59_s24, %s93_s1  ;;  %p99_p10 = scmp.lt.s32.totalorder %s93_s1, %s93_s1 }
  0x17   :  { %28 = vrot.lane.b32.xlu0 %v25_v1, %s120_s21 }
  0x18   :  { %v41_v10 = vrot.slane %v37_v8, %v40_v5  ;;  %v45_v11 = vrot.slane %v37_v8, %v44_v6  ;;  %p100_p11 = por %p99_p10, %p98_p9 }
  0x1a   :  { %vm46_vm2 = vcmp.eq.s32.totalorder %v41_v10, 1  ;;  %vm47_vm3 = vcmp.eq.s32.totalorder %v45_v11, 1  ;;  %p101_p12 = pnand %p100_p11, %p94_p8 }
  0x85   :  { %v27_v12 = vpop.permute.xlu0 %26 }
  0x89   :  { %v29_v13 = vpop.permute.xlu0 %28 }
  0x8a   :  { %v33_v14 = vsel %vm32_vm1, %v27_v12, %v29_v13  ;;  %v34_v15 = vsel %vm32_vm1, %v29_v13, %v27_v12 }
  0x8b   :  { %v48_v16 = vsel %vm46_vm2, %v34_v15, 0.0  ;;  %v49_v17 = vsel %vm47_vm3, %v33_v14, 0.0 }
  0x8c   :  { %50 = vst [vmem:[#allocation5] sm:$0xff] %v48_v16  ;;  %51 = vst [vmem:[#allocation5 + $0x8] sm:$0xff] %v49_v17 }
  0x8d   :  { %104 = shalt.err (!%p101_p12)
}
  0x8e   :  { %s105_s27 = scalar_lea.hbm %s167_s2, 256 }
  0x8f   :  { %p106_p13 = scmp.ne.s32.totalorder %s167_s2, %s105_s27  ;;  %p109_p0 = scmp.lt.u32.totalorder %s105_s27, %s167_s2 }
  0x91   :  { %p111_p1 = pnand %p109_p0, %p106_p13 }
  0x93   :  { %114 = shalt.err (!%p111_p1)
}
  0x94   :  { %61 = dma.vmem_to_hbm [thread:$0]  %s59_s24, 256, %s167_s2, [#allocation4]  }
  0x95   :  { %117 = dma.done.wait [#allocation4], 256  }
  0x96   :  { %118 = vsyncadd [#allocation4], 4294967040 }
  0x97   :  { %65 = vsyncpa [#allocation3], 1 }
  0x98   :  { %66 = vsyncpa [#allocation4], 1 }

</bundles_post_ra>
